<compile_context>
chip_gen: v5e
topology: v5e:2x2
jax: 0.10.0
libtpu: 0.0.40
codegen_flags: <defaults>
</compile_context>

<pallas_src>
import jax
import jax.numpy as jnp
from jax.experimental import pallas as pl
from jax.experimental.pallas import tpu as pltpu

AGENT_CHOICES = 6
AGENT_VIEW = 5 * 5 * 3      # 75
HIDDEN_SIZE = 128

_SELU_ALPHA = 1.6732632423543772848170429916717
_SELU_SCALE = 1.0507009873554804934193349852946


def _selu_unscaled(x):
    # SELU without the outer scale (scale is folded into the next layer's
    # weights): x if x > 0 else alpha * (exp(x) - 1).
    alpha = jnp.asarray(_SELU_ALPHA, x.dtype)
    one = jnp.asarray(1.0, x.dtype)
    return jnp.where(x > 0, x, alpha * (jnp.exp(x) - one))


def policy_kernel(x_ref, w1_ref, b1_ref, w2_ref, b2_ref, w3_ref, o_ref):
    # Elementwise dtype is carried by the biases: bf16 on v6e/v7x, f32 on v5e.
    elem_dtype = b1_ref.dtype

    x = x_ref[...]                                   # already bf16 in HBM

    # Layer 1: Linear (MXU, f32 acc) -> bias + SELU in elem_dtype.
    h1 = jnp.dot(x, w1_ref[...], preferred_element_type=jnp.float32)
    h1 = _selu_unscaled(h1.astype(elem_dtype) + b1_ref[...])

    # Layer 2: Linear -> bias + SELU.  (SELU scale already folded into w2.)
    h2 = jnp.dot(h1.astype(jnp.bfloat16), w2_ref[...],
                 preferred_element_type=jnp.float32)
    h2 = _selu_unscaled(h2.astype(elem_dtype) + b2_ref[...])

    # Layer 3: Linear (no bias; SELU scale folded into w3) + Softmax in f32.
    logits = jnp.dot(h2.astype(jnp.bfloat16), w3_ref[...],
                     preferred_element_type=jnp.float32)
    m = jnp.max(logits, axis=-1, keepdims=True)
    e = jnp.exp(logits - m)
    denom = jnp.sum(e, axis=-1, keepdims=True)
    # NOTE: padded rows of a partial last block may hold garbage -> exp can
    # produce inf/NaN there; rows are independent and out-of-range stores are
    # masked, so results are unaffected. Do NOT add any cross-row reduction.
    probs = e * pl.reciprocal(denom, approx=True)    # EUP vrcp (approx ~1e-4)
    o_ref[...] = probs.astype(o_ref.dtype)


def _round_up(x, m):
    return ((x + m - 1) // m) * m


def policy_forward(x, w1_t, b1, w2_t, b2, w3_t, *, block_batch=8192):
    """x: (B, 75) -> (B, 6) float32 action probabilities.

    Weights are pre-transposed (in, out) and bf16 with the SELU scale folded
    into w2_t / w3_t; biases are (1, 128) in the elementwise dtype.
    Ideally x is already stored in bf16 upstream; otherwise cast once here.
    """
    if x.dtype != jnp.bfloat16:
        x = x.astype(jnp.bfloat16)

    batch = x.shape[0]
    if batch <= 16:
        # Tiny batch: single block equal to the full array (no 8-row padding
        # constraint when block == array extent).
        tb = batch
    else:
        # At least 2 grid steps so v7x's two TensorCores both get work
        # (harmless on single-TC v5e/v6e); tile is a multiple of 8 and capped.
        tb = min(block_batch, _round_up(pl.cdiv(batch, 2), 8))
    grid = (pl.cdiv(batch, tb),)

    x_spec = pl.BlockSpec((tb, AGENT_VIEW), lambda i: (i, 0))
    w1_spec = pl.BlockSpec((AGENT_VIEW, HIDDEN_SIZE), lambda i: (0, 0))
    b1_spec = pl.BlockSpec((1, HIDDEN_SIZE), lambda i: (0, 0))
    w2_spec = pl.BlockSpec((HIDDEN_SIZE, HIDDEN_SIZE), lambda i: (0, 0))
    b2_spec = pl.BlockSpec((1, HIDDEN_SIZE), lambda i: (0, 0))
    w3_spec = pl.BlockSpec((HIDDEN_SIZE, AGENT_CHOICES), lambda i: (0, 0))
    out_spec = pl.BlockSpec((tb, AGENT_CHOICES), lambda i: (i, 0))

    # Scoped-VMEM budget: double-buffered x/out tiles + f32/bf16 intermediates
    # + weights. Floor at 32 MiB (covers v5e's 16 MiB default), cap at 48 MiB
    # (below v7x's 64 MiB physical per-TC VMEM).
    elem_bytes = jnp.dtype(b1.dtype).itemsize
    vmem_budget = (2 * tb * AGENT_VIEW * 2            # bf16 x tile, x2 buffers
                   + 2 * tb * AGENT_CHOICES * 4       # f32 out tile, x2 buffers
                   + 6 * tb * HIDDEN_SIZE * elem_bytes  # h1/h2/exp temporaries
                   + 2 * (1 << 20))                   # weights + slack
    vmem_limit = int(min(max(vmem_budget, 32 << 20), 48 << 20))

    return pl.pallas_call(
        policy_kernel,
        out_shape=jax.ShapeDtypeStruct((batch, AGENT_CHOICES), jnp.float32),
        grid=grid,
        in_specs=[x_spec, w1_spec, b1_spec, w2_spec, b2_spec, w3_spec],
        out_specs=out_spec,
        compiler_params=pltpu.CompilerParams(
            dimension_semantics=("parallel",),        # megacore split on v7x
            vmem_limit_bytes=vmem_limit),
    )(x, w1_t, b1, w2_t, b2, w3_t)


def _elementwise_dtype():
    """bf16 elementwise (bias+SELU) on v6e/v7x; f32 on v5e and older chips
    (their VPU/EUP have no bf16 support)."""
    try:
        kind = jax.devices()[0].device_kind.lower()
    except Exception:
        return jnp.float32
    if ("v6" in kind) or ("v7" in kind):
        return jnp.bfloat16
    return jnp.float32


def init_params(key):
    """Deterministic synthetic parameters matching the PyTorch module shapes
    (stored transposed: (in, out)). Returned in f32, un-folded."""
    k1, k2, k3, kb1, kb2 = jax.random.split(key, 5)

    def uinit(k, shape, fan_in):
        bound = 1.0 / jnp.sqrt(fan_in)
        return jax.random.uniform(k, shape, jnp.float32, -bound, bound)

    # PyTorch shapes: l1.weight (128, 75), l2.weight (128, 128), l3.weight (6, 128)
    w1_t = uinit(k1, (AGENT_VIEW, HIDDEN_SIZE), AGENT_VIEW)          # (75, 128)
    b1 = uinit(kb1, (1, HIDDEN_SIZE), AGENT_VIEW)                    # (1, 128)
    w2_t = uinit(k2, (HIDDEN_SIZE, HIDDEN_SIZE), HIDDEN_SIZE)        # (128, 128)
    b2 = uinit(kb2, (1, HIDDEN_SIZE), HIDDEN_SIZE)                   # (1, 128)
    w3_t = uinit(k3, (HIDDEN_SIZE, AGENT_CHOICES), HIDDEN_SIZE)      # (128, 6)
    return w1_t, b1, w2_t, b2, w3_t


def prepare_kernel_params(w1_t, b1, w2_t, b2, w3_t, *, elem_dtype=jnp.float32):
    """One-time offline prep:
      * MXU operands cast to bf16,
      * SELU scale folded into the *next* layer's weights:
            (scale * selu_u(h1)) @ w2 == selu_u(h1) @ (scale * w2),
      * biases cast to the elementwise dtype (bf16 on v6e/v7x, f32 on v5e)."""
    return (w1_t.astype(jnp.bfloat16),
            b1.astype(elem_dtype),
            (_SELU_SCALE * w2_t).astype(jnp.bfloat16),
            b2.astype(elem_dtype),
            (_SELU_SCALE * w3_t).astype(jnp.bfloat16))


def reference_forward(x, w1_t, b1, w2_t, b2, w3_t):
    """Pure-JAX f32 reference of the PyTorch forward (full SELU with scale)."""
    def selu(v):
        return _SELU_SCALE * jnp.where(v > 0, v, _SELU_ALPHA * (jnp.exp(v) - 1.0))
    h1 = selu(x @ w1_t + b1)
    h2 = selu(h1 @ w2_t + b2)
    return jax.nn.softmax(h2 @ w3_t, axis=-1)


if __name__ == "__main__":
    key = jax.random.PRNGKey(0)
    kx, kp = jax.random.split(key)

    params_f32 = init_params(kp)
    elem_dtype = _elementwise_dtype()
    params_k = prepare_kernel_params(*params_f32, elem_dtype=elem_dtype)

    # Case 1: small batch, single grid step (block == full array).
    batch = 8
    x_f32 = jax.random.normal(kx, (batch, AGENT_VIEW), dtype=jnp.float32)
    x_bf16 = x_f32.astype(jnp.bfloat16)          # producer-side one-time cast
    out = jax.block_until_ready(policy_forward(x_bf16, *params_k))
    ref = reference_forward(x_f32, *params_f32)
    assert out.shape == (batch, AGENT_CHOICES)
    assert bool(jnp.allclose(jnp.sum(out, axis=-1), 1.0, atol=2e-2))
    assert bool(jnp.allclose(out, ref, atol=5e-2, rtol=5e-2))

    # Case 2: multi-step grid (>=2 steps) with a partial last block --
    # exercises tiling, VMEM-resident weights across steps, masked stores.
    batch2 = 40
    x2_f32 = jax.random.normal(jax.random.PRNGKey(1), (batch2, AGENT_VIEW),
                               dtype=jnp.float32)
    x2_bf16 = x2_f32.astype(jnp.bfloat16)
    out2 = jax.block_until_ready(policy_forward(x2_bf16, *params_k))
    ref2 = reference_forward(x2_f32, *params_f32)
    assert out2.shape == (batch2, AGENT_CHOICES)
    assert bool(jnp.allclose(jnp.sum(out2, axis=-1), 1.0, atol=2e-2))
    assert bool(jnp.allclose(out2, ref2, atol=5e-2, rtol=5e-2))

    print("KERNEL_OK")
</pallas_src>

<mosaic_0001>
module attributes {stable_mosaic.version = 11 : i64} {
  func.func @policy_kernel(%arg0: i32, %arg1: memref<8x75xbf16, #tpu.memory_space<vmem>>, %arg2: memref<75x128xbf16, #tpu.memory_space<vmem>>, %arg3: memref<1x128xf32, #tpu.memory_space<vmem>>, %arg4: memref<128x128xbf16, #tpu.memory_space<vmem>>, %arg5: memref<1x128xf32, #tpu.memory_space<vmem>>, %arg6: memref<128x6xbf16, #tpu.memory_space<vmem>>, %arg7: memref<8x6xf32, #tpu.memory_space<vmem>>) attributes {dimension_semantics = [#tpu.dimension_semantics<parallel>], iteration_bounds = array<i64: 1>, scalar_prefetch = 0 : i64, scratch_operands = 0 : i64, tpu.core_type = #tpu.core_type<tc>, window_params = [{transform_indices = @transform_0, window_bounds = array<i64: 8, 75>}, {pipeline_mode = #tpu.pipeline_mode<synchronous>, transform_indices = @transform_1, window_bounds = array<i64: 75, 128>}, {pipeline_mode = #tpu.pipeline_mode<synchronous>, transform_indices = @transform_2, window_bounds = array<i64: 1, 128>}, {pipeline_mode = #tpu.pipeline_mode<synchronous>, transform_indices = @transform_3, window_bounds = array<i64: 128, 128>}, {pipeline_mode = #tpu.pipeline_mode<synchronous>, transform_indices = @transform_4, window_bounds = array<i64: 1, 128>}, {pipeline_mode = #tpu.pipeline_mode<synchronous>, transform_indices = @transform_5, window_bounds = array<i64: 128, 6>}, {transform_indices = @transform_6, window_bounds = array<i64: 8, 6>}]} {
    %c0 = arith.constant 0 : index
    %c0_0 = arith.constant 0 : index
    %0 = vector.load %arg1[%c0, %c0_0] : memref<8x75xbf16, #tpu.memory_space<vmem>>, vector<8x75xbf16>
    %c0_1 = arith.constant 0 : index
    %c0_2 = arith.constant 0 : index
    %1 = vector.load %arg2[%c0_1, %c0_2] : memref<75x128xbf16, #tpu.memory_space<vmem>>, vector<75x128xbf16>
    %cst = arith.constant dense<0.000000e+00> : vector<8x128xf32>
    %2 = tpu.matmul %0, %1, %cst {dimension_numbers = #tpu.dot_dimension_numbers<[1], [0], [0], [1], [0, 0, 1, 1], [], []>} : vector<8x75xbf16>, vector<75x128xbf16>, vector<8x128xf32> -> vector<8x128xf32>
    %c0_3 = arith.constant 0 : index
    %c0_4 = arith.constant 0 : index
    %3 = vector.load %arg3[%c0_3, %c0_4] : memref<1x128xf32, #tpu.memory_space<vmem>>, vector<1x128xf32>
    %4 = vector.broadcast %3 : vector<1x128xf32> to vector<8x128xf32>
    %5 = arith.addf %2, %4 : vector<8x128xf32>
    %cst_5 = arith.constant 0.000000e+00 : f32
    %6 = vector.broadcast %cst_5 : f32 to vector<8x128xf32>
    %7 = arith.cmpf ogt, %5, %6 : vector<8x128xf32>
    %8 = math.exp %5 : vector<8x128xf32>
    %cst_6 = arith.constant 1.000000e+00 : f32
    %9 = vector.broadcast %cst_6 : f32 to vector<8x128xf32>
    %10 = arith.subf %8, %9 : vector<8x128xf32>
    %cst_7 = arith.constant 1.67326319 : f32
    %11 = vector.broadcast %cst_7 : f32 to vector<8x128xf32>
    %12 = arith.mulf %11, %10 : vector<8x128xf32>
    %13 = arith.select %7, %5, %12 : vector<8x128xi1>, vector<8x128xf32>
    %14 = arith.truncf %13 : vector<8x128xf32> to vector<8x128xbf16>
    %c0_8 = arith.constant 0 : index
    %c0_9 = arith.constant 0 : index
    %15 = vector.load %arg4[%c0_8, %c0_9] : memref<128x128xbf16, #tpu.memory_space<vmem>>, vector<128x128xbf16>
    %cst_10 = arith.constant dense<0.000000e+00> : vector<8x128xf32>
    %16 = tpu.matmul %14, %15, %cst_10 {dimension_numbers = #tpu.dot_dimension_numbers<[1], [0], [0], [1], [0, 0, 1, 1], [], []>} : vector<8x128xbf16>, vector<128x128xbf16>, vector<8x128xf32> -> vector<8x128xf32>
    %c0_11 = arith.constant 0 : index
    %c0_12 = arith.constant 0 : index
    %17 = vector.load %arg5[%c0_11, %c0_12] : memref<1x128xf32, #tpu.memory_space<vmem>>, vector<1x128xf32>
    %18 = vector.broadcast %17 : vector<1x128xf32> to vector<8x128xf32>
    %19 = arith.addf %16, %18 : vector<8x128xf32>
    %cst_13 = arith.constant 0.000000e+00 : f32
    %20 = vector.broadcast %cst_13 : f32 to vector<8x128xf32>
    %21 = arith.cmpf ogt, %19, %20 : vector<8x128xf32>
    %22 = math.exp %19 : vector<8x128xf32>
    %cst_14 = arith.constant 1.000000e+00 : f32
    %23 = vector.broadcast %cst_14 : f32 to vector<8x128xf32>
    %24 = arith.subf %22, %23 : vector<8x128xf32>
    %cst_15 = arith.constant 1.67326319 : f32
    %25 = vector.broadcast %cst_15 : f32 to vector<8x128xf32>
    %26 = arith.mulf %25, %24 : vector<8x128xf32>
    %27 = arith.select %21, %19, %26 : vector<8x128xi1>, vector<8x128xf32>
    %28 = arith.truncf %27 : vector<8x128xf32> to vector<8x128xbf16>
    %c0_16 = arith.constant 0 : index
    %c0_17 = arith.constant 0 : index
    %29 = vector.load %arg6[%c0_16, %c0_17] : memref<128x6xbf16, #tpu.memory_space<vmem>>, vector<128x6xbf16>
    %cst_18 = arith.constant dense<0.000000e+00> : vector<8x6xf32>
    %30 = tpu.matmul %28, %29, %cst_18 {dimension_numbers = #tpu.dot_dimension_numbers<[1], [0], [0], [1], [0, 0, 1, 1], [], []>} : vector<8x128xbf16>, vector<128x6xbf16>, vector<8x6xf32> -> vector<8x6xf32>
    %cst_19 = arith.constant dense<0xFF800000> : vector<8xf32>
    %31 = vector.multi_reduction <maximumf>, %30, %cst_19 [1] : vector<8x6xf32> to vector<8xf32>
    %32 = vector.shape_cast %31 : vector<8xf32> to vector<8x1xf32>
    %33 = vector.broadcast %32 : vector<8x1xf32> to vector<8x6xf32>
    %34 = arith.subf %30, %33 : vector<8x6xf32>
    %35 = math.exp %34 : vector<8x6xf32>
    %cst_20 = arith.constant dense<0.000000e+00> : vector<8xf32>
    %36 = vector.multi_reduction <add>, %35, %cst_20 [1] : vector<8x6xf32> to vector<8xf32>
    %37 = vector.shape_cast %36 : vector<8xf32> to vector<8x1xf32>
    %38 = tpu.reciprocal %37 {approx = true} : vector<8x1xf32> -> vector<8x1xf32>
    %39 = vector.broadcast %38 : vector<8x1xf32> to vector<8x6xf32>
    %40 = arith.mulf %35, %39 : vector<8x6xf32>
    %c0_21 = arith.constant 0 : index
    %c0_22 = arith.constant 0 : index
    %41 = vector.load %arg7[%c0_21, %c0_22] : memref<8x6xf32, #tpu.memory_space<vmem>>, vector<8x6xf32>
    tpu.vector_store %arg7[%c0_21, %c0_22], %40 {strides = array<i32>} : memref<8x6xf32, #tpu.memory_space<vmem>>, vector<8x6xf32>,
    return
  }
  func.func @transform_0(%arg0: i32) -> (i32, i32) {
    %c0_i32 = arith.constant 0 : i32
    %c0_i32_0 = arith.constant 0 : i32
    return %arg0, %c0_i32 : i32, i32
  }
  func.func @transform_1(%arg0: i32) -> (i32, i32) {
    %c0_i32 = arith.constant 0 : i32
    %c0_i32_0 = arith.constant 0 : i32
    %c0_i32_1 = arith.constant 0 : i32
    return %c0_i32, %c0_i32_0 : i32, i32
  }
  func.func @transform_2(%arg0: i32) -> (i32, i32) {
    %c0_i32 = arith.constant 0 : i32
    %c0_i32_0 = arith.constant 0 : i32
    %c0_i32_1 = arith.constant 0 : i32
    return %c0_i32, %c0_i32_0 : i32, i32
  }
  func.func @transform_3(%arg0: i32) -> (i32, i32) {
    %c0_i32 = arith.constant 0 : i32
    %c0_i32_0 = arith.constant 0 : i32
    %c0_i32_1 = arith.constant 0 : i32
    return %c0_i32, %c0_i32_0 : i32, i32
  }
  func.func @transform_4(%arg0: i32) -> (i32, i32) {
    %c0_i32 = arith.constant 0 : i32
    %c0_i32_0 = arith.constant 0 : i32
    %c0_i32_1 = arith.constant 0 : i32
    return %c0_i32, %c0_i32_0 : i32, i32
  }
  func.func @transform_5(%arg0: i32) -> (i32, i32) {
    %c0_i32 = arith.constant 0 : i32
    %c0_i32_0 = arith.constant 0 : i32
    %c0_i32_1 = arith.constant 0 : i32
    return %c0_i32, %c0_i32_0 : i32, i32
  }
  func.func @transform_6(%arg0: i32) -> (i32, i32) {
    %c0_i32 = arith.constant 0 : i32
    %c0_i32_0 = arith.constant 0 : i32
    return %arg0, %c0_i32 : i32, i32
  }
}

</mosaic_0001>

<bundles_post_ra>
// kernel: tpu_custom_call.1
= control target key start
LH: loop header
LB: loop body
LE: loop exit
PB: predicated region body
PF: predicated region fallthrough
CT: control target
= control target key end

     0   :  { %11 = vsyncpa [#allocation3], 0  ;;  %s674_s0 = inlined_call_operand.vmem [shape: bf16[8,75], index: 0, kind: input, shape index: {}]   ;;  %s675_s1 = inlined_call_operand.hbm [shape: bf16[75,128], index: 1, kind: input, shape index: {}]   ;;  %s676_s2 = inlined_call_operand.hbm [shape: f32[1,128], index: 2, kind: input, shape index: {}]   ;;  %s677_s3 = inlined_call_operand.vmem [shape: bf16[128,128], index: 3, kind: input, shape index: {}]   ;;  %s678_s4 = inlined_call_operand.hbm [shape: f32[1,128], index: 4, kind: input, shape index: {}]   ;;  %s679_s5 = inlined_call_operand.vmem [shape: bf16[128,6], index: 5, kind: input, shape index: {}]   ;;  %s680_s6 = inlined_call_operand.hbm [shape: f32[8,6], index: 6, kind: output, shape index: {}]  }
   0x1   :  { %12 = vsyncpa [#allocation6], 0  ;;  %s34_s23 = sshll.u32 %s676_s2, 4  ;;  %s35_s23 = int_to_ptr.hbm [resolvable:$true] %s34_s23 }
   0x2   :  { %13 = vsyncpa [#allocation4], 0  ;;  %s566_s24 = smov [#allocation5]   ;;  %s20_s28 = sshll.u32 %s675_s1, 4  ;;  %s21_s28 = int_to_ptr.hbm [resolvable:$true] %s20_s28 }
   0x3   :  { %s36_s25 = sshll.u32 %s566_s24, 4  ;;  %s567_s29 = smov [#allocation2]   ;;  %s37_s25 = int_to_ptr.vmem [resolvable:$true] %s36_s25 }
   0x4   :  { %39 = dma.hbm_to_vmem [thread:$0]  %s35_s23, 16, %s37_s25, [#allocation6]  }
   0x5   :  { %s22_s30 = sshll.u32 %s567_s29, 4  ;;  %s568_s7 = smov 64   ;;  %s23_s30 = int_to_ptr.vmem [resolvable:$true] %s22_s30 }
   0x6   :  { %s569_s8 = smov 4   ;;  %s47_s2 = sshll.u32 %s678_s4, 4  ;;  %s48_s2 = int_to_ptr.hbm [resolvable:$true] %s47_s2 }
   0x7   :  { %28 = dma.hbm_to_vmem [thread:$0]  %s21_s28, 640, %s23_s30, [#allocation3], %s568_s7, %s568_s7, %s569_s8  }
   0x8   :  { %s570_s11 = smov [#allocation7]  }
   0x9   :  { %s49_s12 = sshll.u32 %s570_s11, 4  ;;  %s50_s12 = int_to_ptr.vmem [resolvable:$true] %s49_s12 }
   0xa   :  { %52 = dma.hbm_to_vmem [thread:$0]  %s48_s2, 16, %s50_s12, [#allocation6]  }
   0xb   :  { %560 = dma.done.wait [#allocation3], 640  }
   0xc   :  { %561 = vsyncadd [#allocation3], 4294966656 }
   0xd   :  { %562 = dma.done.wait [#allocation6], 32  }
   0xe   :  { %563 = vsyncadd [#allocation6], 4294967264  ;;  %vm116_vm0 = vcmask 1044480   ;;  %vm117_vm1 = vcmask 1045504   ;;  %v571_v0 = vmov 65535   ;;  %v438_v6 = vld [vmem:[%s677_s3 + $0x38] sm:$0xff] }
   0xf   :  { %v118_v1 = vsel %vm116_vm0, 4294967295, %v571_v0  ;;  %v357_v2 = vld [vmem:[#allocation2 + $0x20] sm:$0xf]  ;;  %v430_v3 = vld [vmem:[#allocation2 + $0x20] sm:$0x30]  ;;  %211 = vmatpush.bf16.msra.mxu1 %v438_v6  ;;  %v437_v8 = vld [vmem:[%s677_s3 + $0x30] sm:$0xff] }
  0x10   :  { %v119_v4 = vsel %vm117_vm1, %v118_v1, 0  ;;  %v358_v5 = vor.u32 %v430_v3, %v357_v2  ;;  %v429_v9 = vld [vmem:[#allocation2 + $0x18] sm:$0xff]  ;;  %v436_v10 = vld [vmem:[%s677_s3 + $0x28] sm:$0xff]  ;;  %v428_v11 = vld [vmem:[#allocation2 + $0x10] sm:$0xff]  ;;  %vm112_vm2 = vcmask 613376   ;;  %vm308_vm5 = vcmask 48128  }
  0x11   :  { %v427_v12 = vld [vmem:[#allocation2 + $0x8] sm:$0xff]  ;;  %v426_v13 = vld [vmem:[#allocation2] sm:$0xff]  ;;  %v434_v16 = vld [vmem:[%s677_s3 + $0x18] sm:$0xff]  ;;  %s328_s19 = sshll.u32 %s680_s6, 4  ;;  %s329_s19 = int_to_ptr.hbm [resolvable:$true] %s328_s19 }
  0x12   :  { %v121_v7 = vand.u32 %v358_v5, %v119_v4  ;;  %v68_v14 = vld [vmem:[%s674_s0] sm:$0xf]  ;;  %v433_v17 = vld [vmem:[%s677_s3 + $0x10] sm:$0xff]  ;;  %v432_v18 = vld [vmem:[%s677_s3 + $0x8] sm:$0xff] }
  0x13   :  { %212 = vmatpush.bf16.msra.mxu1 %v437_v8  ;;  %v435_v15 = vld [vmem:[%s677_s3 + $0x20] sm:$0xff]  ;;  %v446_v20 = vld [vmem:[%s679_s5 + $0x38] sm:$0xff]  ;;  %v445_v21 = vld [vmem:[%s679_s5 + $0x30] sm:$0xff] }
  0x14   :  { %126 = vmatpush.bf16.msra.mxu0 %v121_v7  ;;  %v431_v19 = vld [vmem:[%s677_s3] sm:$0xff]  ;;  %295 = vmatpush.bf16.msra.mxu2 %v446_v20  ;;  %v444_v22 = vld [vmem:[%s679_s5 + $0x28] sm:$0xff]  ;;  %v442_v34 = vld [vmem:[%s679_s5 + $0x18] sm:$0xff] }
  0x15   :  { %v454_v23 = vld [vmem:[#allocation5] ss:$0 sm:$0xff]  ;;  %v443_v33 = vld [vmem:[%s679_s5 + $0x20] sm:$0xff]  ;;  %v441_v35 = vld [vmem:[%s679_s5 + $0x10] sm:$0xff] }
  0x16   :  { %v440_v36 = vld [vmem:[%s679_s5 + $0x8] sm:$0xff]  ;;  %v439_v37 = vld [vmem:[%s679_s5] sm:$0xff]  ;;  %s572_s5 = smov [#allocation8]  }
  0x17   :  { %213 = vmatpush.bf16.msra.mxu1 %v436_v10  ;;  %v455_v38 = vld [vmem:[#allocation7] ss:$0 sm:$0xff]  ;;  %s326_s16 = sshll.u32 %s572_s5, 4  ;;  %s327_s16 = int_to_ptr.vmem [resolvable:$true] %s326_s16 }
  0x18   :  { %127 = vmatpush.bf16.msra.mxu0 %v429_v9  ;;  %296 = vmatpush.bf16.msra.mxu2 %v445_v21 }
  0x1b   :  { %214 = vmatpush.bf16.msra.mxu1 %v435_v15 }
  0x1c   :  { %128 = vmatpush.bf16.msra.mxu0 %v428_v11  ;;  %297 = vmatpush.bf16.msra.mxu2 %v444_v22 }
  0x1f   :  { %215 = vmatpush.bf16.msra.mxu1 %v434_v16 }
  0x20   :  { %129 = vmatpush.bf16.msra.mxu0 %v427_v12  ;;  %298 = vmatpush.bf16.msra.mxu2 %v443_v33 }
  0x23   :  { %216 = vmatpush.bf16.msra.mxu1 %v433_v17 }
  0x24   :  { %130 = vmatpush.bf16.msra.mxu0 %v426_v13  ;;  %299 = vmatpush.bf16.msra.mxu2 %v442_v34 }
  0x27   :  { %359 = vmatmul.msk.bf16.vlgmr.msra.gmra.mxu0 %vm112_vm2, %v68_v14  ;;  %217 = vmatpush.bf16.msra.mxu1 %v432_v18 }
  0x28   :  { %300 = vmatpush.bf16.msra.mxu2 %v441_v35 }
  0x2b   :  { %218 = vmatpush.bf16.msra.mxu1 %v431_v19 }
  0x2c   :  { %301 = vmatpush.bf16.msra.mxu2 %v440_v36 }
  0x30   :  { %302 = vmatpush.bf16.msra.mxu2 %v439_v37 }
  0xa4   :  { %v132_v24 = vpop.f32.mrf.mxu0 }
  0xa5   :  { %v133_v25 = vadd.f32 %v454_v23, %v132_v24 }
  0xa7   :  { %v137_v26 = vmul.f32 1.442695, %v133_v25  ;;  %vm136_vm3 = vcmp.gt.f32.partialorder %v133_v25, 0.0 }
  0xa9   :  { %456 = vpow2.f32 %v137_v26 }
  0xac   :  { %v134_v27 = vpop.f32.mrf.mxu0 }
  0xaf   :  { %v457_v28 = vpop.eup %456 }
  0xb0   :  { %v360_v29 = vadd.f32 -1.0, %v457_v28 }
  0xb2   :  { %v140_v30 = vmul.f32 1.6732632, %v360_v29 }
  0xb4   :  { %v141_v31 = vsel %vm136_vm3, %v133_v25, %v140_v30 }
  0xb5   :  { %v142_v32 = vpack.c.bf16 %v141_v31, %v141_v31 }
  0xb7   :  { %219 = vmatmul.bf16.vlgmr.msra.gmra.mxu1 %v142_v32 }
 0x134   :  { %v220_v39 = vpop.f32.mrf.mxu1 }
 0x135   :  { %v221_v40 = vadd.f32 %v455_v38, %v220_v39 }
 0x137   :  { %v225_v41 = vmul.f32 1.442695, %v221_v40  ;;  %vm224_vm4 = vcmp.gt.f32.partialorder %v221_v40, 0.0 }
 0x139   :  { %458 = vpow2.f32 %v225_v41 }
 0x13c   :  { %v222_v42 = vpop.f32.mrf.mxu1 }
 0x13f   :  { %v459_v43 = vpop.eup %458 }
 0x140   :  { %v393_v44 = vadd.f32 -1.0, %v459_v43 }
 0x142   :  { %v228_v45 = vmul.f32 1.6732632, %v393_v44 }
 0x144   :  { %v229_v46 = vsel %vm224_vm4, %v221_v40, %v228_v45 }
 0x145   :  { %v230_v47 = vpack.c.bf16 %v229_v46, %v229_v46 }
 0x147   :  { %303 = vmatmul.bf16.vlgmr.msra.gmra.mxu2 %v230_v47 }
 0x1ca   :  { %v304_v48 = vpop.f32.mrf.mxu2 }
 0x1cb   :  { %v309_v49 = vsel %vm308_vm5, %v304_v48, -inf }
 0x1cc   :  { %310 = vmax.xlane.f32.xlu0 %v309_v49 }
 0x1d2   :  { %v306_v50 = vpop.f32.mrf.mxu2 }
 0x23f   :  { %v311_v51 = vpop.xlane.xlu0 %310 }
 0x240   :  { %v312_v52 = vsub.f32 %v304_v48, %v311_v51 }
 0x242   :  { %v313_v53 = vmul.f32 1.442695, %v312_v52 }
 0x244   :  { %460 = vpow2.f32 %v313_v53 }
 0x24a   :  { %v461_v54 = vpop.eup %460 }
 0x24b   :  { %v315_v55 = vsel %vm308_vm5, %v461_v54, 0.0 }
 0x24c   :  { %316 = vadd.xlane.f32.xlu0 %v315_v55 }
 0x2bf   :  { %v317_v56 = vpop.xlane.xlu0 %316 }
 0x2c0   :  { %462 = vrcp.f32 %v317_v56 }
 0x2c6   :  { %v463_v57 = vpop.eup %462 }
 0x2c7   :  { %v319_v58 = vmul.f32 %v463_v57, %v461_v54 }
 0x2c9   :  { %320 = vst.msk [vmem:[#allocation8] sm:$0xff] %vm308_vm5, %v319_v58 }
 0x2ca   :  { %331 = dma.vmem_to_hbm [thread:$0]  %s327_s16, 128, %s329_s19, [#allocation4]  }
 0x2cb   :  { %564 = dma.done.wait [#allocation4], 128  }
 0x2cc   :  { %565 = vsyncadd [#allocation4], 4294967168 }
 0x2cd   :  { %336 = vsyncpa [#allocation3], 1 }
 0x2ce   :  { %337 = vsyncpa [#allocation6], 1 }
 0x2cf   :  { %338 = vsyncpa [#allocation4], 1 }

</bundles_post_ra>
